<compile_context>
chip_gen: v7x
topology: tpu7x:2x2x1
jax: 0.10.0
libtpu: 0.0.40
codegen_flags: <defaults>
</compile_context>

<pallas_src>
import jax
import jax.numpy as jnp
from jax.experimental import pallas as pl
from jax.experimental.pallas import tpu as pltpu

_LANE = 128


def _round_up(x, m):
    return (x + m - 1) // m * m


def _hardswish(x):
    # PyTorch nn.Hardswish: x * clamp(x + 3, 0, 6) / 6
    return x * jnp.clip(x + 3.0, 0.0, 6.0) * (1.0 / 6.0)


def actor_ppo_kernel(x_ref,
                     w1_ref, b1_ref,
                     w2_ref, b2_ref,
                     w3_ref, b3_ref,
                     w4_ref, b4_ref,
                     o_ref):
    # Four MXU dots with f32 accumulation; bias + activations in f32 on VPU/EUP.
    x = x_ref[...]

    h1 = jnp.dot(x, w1_ref[...], preferred_element_type=jnp.float32) + b1_ref[...]
    h1 = jnp.maximum(h1, 0.0)                                        # ReLU

    h2 = jnp.dot(h1.astype(w2_ref.dtype), w2_ref[...],
                 preferred_element_type=jnp.float32) + b2_ref[...]
    h2 = jnp.maximum(h2, 0.0)                                        # ReLU

    h3 = jnp.dot(h2.astype(w3_ref.dtype), w3_ref[...],
                 preferred_element_type=jnp.float32) + b3_ref[...]
    h3 = _hardswish(h3)                                              # Hardswish

    z4 = jnp.dot(h3.astype(w4_ref.dtype), w4_ref[...],
                 preferred_element_type=jnp.float32) + b4_ref[...]
    o_ref[...] = jnp.tanh(z4)                                        # final .tanh()


def prepare_params(params, compute_dtype=jnp.bfloat16):
    """One-time (hoisted) prep: pad mid_dim to 128 lanes, cast weights to the
    MXU streaming dtype. Zero padding is exact: padded hidden lanes stay 0 through
    ReLU/Hardswish and padded weight rows contribute nothing to the dots.
    state_dim / action_dim stay unpadded (batch-scaled streams stay minimal)."""
    w1, b1, w2, b2, w3, b3, w4, b4 = params
    state_dim, mid_dim = w1.shape
    action_dim = w4.shape[1]
    md_p = _round_up(mid_dim, _LANE)

    def pad_to(a, rows, cols):
        return jnp.pad(a, ((0, rows - a.shape[0]), (0, cols - a.shape[1])))

    return (
        pad_to(w1, state_dim, md_p).astype(compute_dtype),
        pad_to(b1, 1, md_p).astype(jnp.float32),
        pad_to(w2, md_p, md_p).astype(compute_dtype),
        pad_to(b2, 1, md_p).astype(jnp.float32),
        pad_to(w3, md_p, md_p).astype(compute_dtype),
        pad_to(b3, 1, md_p).astype(jnp.float32),
        pad_to(w4, md_p, action_dim).astype(compute_dtype),
        pad_to(b4, 1, action_dim).astype(jnp.float32),
    )


def actor_ppo_forward(state, prepared_params, *, tile_b=1024):
    """Fused MLP forward. state: (B, state_dim). Returns (B, action_dim) f32.

    prepared_params comes from prepare_params(); its weight dtype (bf16 default)
    sets the streaming/MXU-operand dtype. Accumulation and elementwise math are
    always f32. With bf16, the state is also quantized to bf16 (tolerance ~1e-2)."""
    w1p, b1p, w2p, b2p, w3p, b3p, w4p, b4p = prepared_params
    B, state_dim = state.shape
    action_dim = w4p.shape[1]
    md_p = w1p.shape[1]
    compute_dtype = w1p.dtype

    if state.dtype != compute_dtype:
        state = state.astype(compute_dtype)   # single cast; halves state DMA for bf16

    # Batch tiling: no batch padding. Either one/two full-batch blocks, or
    # grid = cdiv(B, tile_b) with a ragged last block (rows are independent,
    # OOB output stores are masked, so garbage pad rows never touch valid rows).
    sub = 16 if compute_dtype == jnp.bfloat16 else 8    # bf16 packs 16 sublanes/vreg
    if tile_b >= B:
        tile_b, grid_b = B, 1
        if B >= 2 * sub:                                # give v7x's 2nd TC work
            tile_b = _round_up(pl.cdiv(B, 2), sub)
            grid_b = pl.cdiv(B, tile_b)
    else:
        tile_b = max(sub, (tile_b // sub) * sub)
        grid_b = pl.cdiv(B, tile_b)

    # Weights/biases: whole array resident every grid step (block index fixed at 0).
    def full_spec(shape):
        return pl.BlockSpec(shape, lambda i: (0,) * len(shape))

    flops = 2 * B * (state_dim * md_p + 2 * md_p * md_p + md_p * action_dim)
    bytes_accessed = (int(state.size) * state.dtype.itemsize
                      + sum(int(a.size) * a.dtype.itemsize for a in prepared_params)
                      + B * action_dim * 4)
    cost = pl.CostEstimate(flops=int(flops),
                           transcendentals=int(B * action_dim),    # tanh
                           bytes_accessed=int(bytes_accessed))

    return pl.pallas_call(
        actor_ppo_kernel,
        out_shape=jax.ShapeDtypeStruct((B, action_dim), jnp.float32),
        grid_spec=pltpu.PrefetchScalarGridSpec(
            num_scalar_prefetch=0,
            grid=(grid_b,),
            in_specs=[
                pl.BlockSpec((tile_b, state_dim), lambda i: (i, 0)),  # state tile
                full_spec(w1p.shape), full_spec(b1p.shape),
                full_spec(w2p.shape), full_spec(b2p.shape),
                full_spec(w3p.shape), full_spec(b3p.shape),
                full_spec(w4p.shape), full_spec(b4p.shape),
            ],
            out_specs=pl.BlockSpec((tile_b, action_dim), lambda i: (i, 0)),
        ),
        compiler_params=pltpu.CompilerParams(
            dimension_semantics=("parallel",)),          # megacore-shardable on v7x
        cost_estimate=cost,
    )(state, w1p, b1p, w2p, b2p, w3p, b3p, w4p, b4p)


def init_params(key, state_dim, mid_dim, action_dim):
    """Deterministic synthetic init, PyTorch-Linear-like uniform(+-1/sqrt(fan_in)).
    Weights stored as (in, out)."""
    dims = [(state_dim, mid_dim), (mid_dim, mid_dim), (mid_dim, mid_dim),
            (mid_dim, action_dim)]
    params = []
    for (fan_in, fan_out) in dims:
        key, kw, kb = jax.random.split(key, 3)
        bound = 1.0 / jnp.sqrt(jnp.float32(fan_in))
        w = jax.random.uniform(kw, (fan_in, fan_out), jnp.float32, -bound, bound)
        b = jax.random.uniform(kb, (1, fan_out), jnp.float32, -bound, bound)
        params += [w, b]
    return tuple(params)


def reference_forward(state, params):
    w1, b1, w2, b2, w3, b3, w4, b4 = params
    h = jnp.maximum(state @ w1 + b1, 0.0)
    h = jnp.maximum(h @ w2 + b2, 0.0)
    h = h @ w3 + b3
    h = h * jnp.clip(h + 3.0, 0.0, 6.0) / 6.0
    return jnp.tanh(h @ w4 + b4)


if __name__ == "__main__":
    # Small shapes consistent with ActorPPO(mid_dim=32, state_dim=16, action_dim=4)
    B, state_dim, mid_dim, action_dim = 16, 16, 32, 4

    key = jax.random.PRNGKey(0)
    key, k_state = jax.random.split(key)
    state = jax.random.normal(k_state, (B, state_dim), jnp.float32)
    params = init_params(key, state_dim, mid_dim, action_dim)
    ref = reference_forward(state, params)

    # 1) f32 streaming path: bit-exact check against the pure-JAX reference.
    params_f32 = prepare_params(params, compute_dtype=jnp.float32)
    out = jax.block_until_ready(actor_ppo_forward(state, params_f32))
    assert out.shape == (B, action_dim)
    assert jnp.allclose(out, ref, atol=1e-5, rtol=1e-5), "f32 mismatch vs reference"

    # 2) default bf16 streaming path (v5e/v6e/v7x): operands quantized to bf16,
    #    f32 accumulation/activations, so compare at a looser tolerance.
    params_bf16 = prepare_params(params)        # compute_dtype=jnp.bfloat16
    out_bf = jax.block_until_ready(actor_ppo_forward(state, params_bf16))
    assert out_bf.shape == (B, action_dim)
    assert jnp.allclose(out_bf, ref, atol=5e-2, rtol=5e-2), "bf16 mismatch vs reference"

    # TODO(synk): get_action / get_logprob_entropy / get_old_logprob (Gaussian
    # sampling, logprob reductions, entropy) are not part of forward(); only
    # forward() is implemented as a kernel.
    print("KERNEL_OK")
</pallas_src>

<mosaic_0001>
module attributes {stable_mosaic.version = 11 : i64} {
  func.func @actor_ppo_kernel(%arg0: i32, %arg1: memref<8x16xf32, #tpu.memory_space<vmem>>, %arg2: memref<16x128xf32, #tpu.memory_space<vmem>>, %arg3: memref<1x128xf32, #tpu.memory_space<vmem>>, %arg4: memref<128x128xf32, #tpu.memory_space<vmem>>, %arg5: memref<1x128xf32, #tpu.memory_space<vmem>>, %arg6: memref<128x128xf32, #tpu.memory_space<vmem>>, %arg7: memref<1x128xf32, #tpu.memory_space<vmem>>, %arg8: memref<128x4xf32, #tpu.memory_space<vmem>>, %arg9: memref<1x4xf32, #tpu.memory_space<vmem>>, %arg10: memref<8x4xf32, #tpu.memory_space<vmem>>) attributes {dimension_semantics = [#tpu.dimension_semantics<parallel>], iteration_bounds = array<i64: 2>, scalar_prefetch = 0 : i64, scratch_operands = 0 : i64, tpu.core_type = #tpu.core_type<tc>, window_params = [{transform_indices = @transform_0, window_bounds = array<i64: 8, 16>}, {pipeline_mode = #tpu.pipeline_mode<synchronous>, transform_indices = @transform_1, window_bounds = array<i64: 16, 128>}, {pipeline_mode = #tpu.pipeline_mode<synchronous>, transform_indices = @transform_2, window_bounds = array<i64: 1, 128>}, {pipeline_mode = #tpu.pipeline_mode<synchronous>, transform_indices = @transform_3, window_bounds = array<i64: 128, 128>}, {pipeline_mode = #tpu.pipeline_mode<synchronous>, transform_indices = @transform_4, window_bounds = array<i64: 1, 128>}, {pipeline_mode = #tpu.pipeline_mode<synchronous>, transform_indices = @transform_5, window_bounds = array<i64: 128, 128>}, {pipeline_mode = #tpu.pipeline_mode<synchronous>, transform_indices = @transform_6, window_bounds = array<i64: 1, 128>}, {pipeline_mode = #tpu.pipeline_mode<synchronous>, transform_indices = @transform_7, window_bounds = array<i64: 128, 4>}, {pipeline_mode = #tpu.pipeline_mode<synchronous>, transform_indices = @transform_8, window_bounds = array<i64: 1, 4>}, {transform_indices = @transform_9, window_bounds = array<i64: 8, 4>}]} {
    %c0 = arith.constant 0 : index
    %c0_0 = arith.constant 0 : index
    %0 = vector.load %arg1[%c0, %c0_0] : memref<8x16xf32, #tpu.memory_space<vmem>>, vector<8x16xf32>
    %c0_1 = arith.constant 0 : index
    %c0_2 = arith.constant 0 : index
    %1 = vector.load %arg2[%c0_1, %c0_2] : memref<16x128xf32, #tpu.memory_space<vmem>>, vector<16x128xf32>
    %cst = arith.constant dense<0.000000e+00> : vector<8x128xf32>
    %2 = tpu.matmul %0, %1, %cst {dimension_numbers = #tpu.dot_dimension_numbers<[1], [0], [0], [1], [0, 0, 1, 1], [], []>} : vector<8x16xf32>, vector<16x128xf32>, vector<8x128xf32> -> vector<8x128xf32>
    %c0_3 = arith.constant 0 : index
    %c0_4 = arith.constant 0 : index
    %3 = vector.load %arg3[%c0_3, %c0_4] : memref<1x128xf32, #tpu.memory_space<vmem>>, vector<1x128xf32>
    %4 = vector.broadcast %3 : vector<1x128xf32> to vector<8x128xf32>
    %5 = arith.addf %2, %4 : vector<8x128xf32>
    %cst_5 = arith.constant 0.000000e+00 : f32
    %6 = vector.broadcast %cst_5 : f32 to vector<8x128xf32>
    %7 = arith.maximumf %5, %6 : vector<8x128xf32>
    %c0_6 = arith.constant 0 : index
    %c0_7 = arith.constant 0 : index
    %8 = vector.load %arg4[%c0_6, %c0_7] : memref<128x128xf32, #tpu.memory_space<vmem>>, vector<128x128xf32>
    %cst_8 = arith.constant dense<0.000000e+00> : vector<8x128xf32>
    %9 = tpu.matmul %7, %8, %cst_8 {dimension_numbers = #tpu.dot_dimension_numbers<[1], [0], [0], [1], [0, 0, 1, 1], [], []>} : vector<8x128xf32>, vector<128x128xf32>, vector<8x128xf32> -> vector<8x128xf32>
    %c0_9 = arith.constant 0 : index
    %c0_10 = arith.constant 0 : index
    %10 = vector.load %arg5[%c0_9, %c0_10] : memref<1x128xf32, #tpu.memory_space<vmem>>, vector<1x128xf32>
    %11 = vector.broadcast %10 : vector<1x128xf32> to vector<8x128xf32>
    %12 = arith.addf %9, %11 : vector<8x128xf32>
    %cst_11 = arith.constant 0.000000e+00 : f32
    %13 = vector.broadcast %cst_11 : f32 to vector<8x128xf32>
    %14 = arith.maximumf %12, %13 : vector<8x128xf32>
    %c0_12 = arith.constant 0 : index
    %c0_13 = arith.constant 0 : index
    %15 = vector.load %arg6[%c0_12, %c0_13] : memref<128x128xf32, #tpu.memory_space<vmem>>, vector<128x128xf32>
    %cst_14 = arith.constant dense<0.000000e+00> : vector<8x128xf32>
    %16 = tpu.matmul %14, %15, %cst_14 {dimension_numbers = #tpu.dot_dimension_numbers<[1], [0], [0], [1], [0, 0, 1, 1], [], []>} : vector<8x128xf32>, vector<128x128xf32>, vector<8x128xf32> -> vector<8x128xf32>
    %c0_15 = arith.constant 0 : index
    %c0_16 = arith.constant 0 : index
    %17 = vector.load %arg7[%c0_15, %c0_16] : memref<1x128xf32, #tpu.memory_space<vmem>>, vector<1x128xf32>
    %18 = vector.broadcast %17 : vector<1x128xf32> to vector<8x128xf32>
    %19 = arith.addf %16, %18 : vector<8x128xf32>
    %cst_17 = arith.constant 3.000000e+00 : f32
    %20 = vector.broadcast %cst_17 : f32 to vector<8x128xf32>
    %21 = arith.addf %19, %20 : vector<8x128xf32>
    %cst_18 = arith.constant 0.000000e+00 : f32
    %cst_19 = arith.constant 6.000000e+00 : f32
    %22 = vector.broadcast %cst_18 : f32 to vector<8x128xf32>
    %23 = arith.maximumf %22, %21 : vector<8x128xf32>
    %24 = vector.broadcast %cst_19 : f32 to vector<8x128xf32>
    %25 = arith.minimumf %24, %23 : vector<8x128xf32>
    %26 = arith.mulf %19, %25 : vector<8x128xf32>
    %cst_20 = arith.constant 0.166666672 : f32
    %27 = vector.broadcast %cst_20 : f32 to vector<8x128xf32>
    %28 = arith.mulf %26, %27 : vector<8x128xf32>
    %c0_21 = arith.constant 0 : index
    %c0_22 = arith.constant 0 : index
    %29 = vector.load %arg8[%c0_21, %c0_22] : memref<128x4xf32, #tpu.memory_space<vmem>>, vector<128x4xf32>
    %cst_23 = arith.constant dense<0.000000e+00> : vector<8x4xf32>
    %30 = tpu.matmul %28, %29, %cst_23 {dimension_numbers = #tpu.dot_dimension_numbers<[1], [0], [0], [1], [0, 0, 1, 1], [], []>} : vector<8x128xf32>, vector<128x4xf32>, vector<8x4xf32> -> vector<8x4xf32>
    %c0_24 = arith.constant 0 : index
    %c0_25 = arith.constant 0 : index
    %31 = vector.load %arg9[%c0_24, %c0_25] : memref<1x4xf32, #tpu.memory_space<vmem>>, vector<1x4xf32>
    %32 = vector.broadcast %31 : vector<1x4xf32> to vector<8x4xf32>
    %33 = arith.addf %30, %32 : vector<8x4xf32>
    %34 = math.tanh %33 : vector<8x4xf32>
    %c0_26 = arith.constant 0 : index
    %c0_27 = arith.constant 0 : index
    %35 = vector.load %arg10[%c0_26, %c0_27] : memref<8x4xf32, #tpu.memory_space<vmem>>, vector<8x4xf32>
    tpu.vector_store %arg10[%c0_26, %c0_27], %34 {strides = array<i32>} : memref<8x4xf32, #tpu.memory_space<vmem>>, vector<8x4xf32>,
    return
  }
  func.func @transform_0(%arg0: i32) -> (i32, i32) {
    %c0_i32 = arith.constant 0 : i32
    %c0_i32_0 = arith.constant 0 : i32
    return %arg0, %c0_i32 : i32, i32
  }
  func.func @transform_1(%arg0: i32) -> (i32, i32) {
    %c0_i32 = arith.constant 0 : i32
    %c0_i32_0 = arith.constant 0 : i32
    %c0_i32_1 = arith.constant 0 : i32
    return %c0_i32, %c0_i32_0 : i32, i32
  }
  func.func @transform_2(%arg0: i32) -> (i32, i32) {
    %c0_i32 = arith.constant 0 : i32
    %c0_i32_0 = arith.constant 0 : i32
    %c0_i32_1 = arith.constant 0 : i32
    return %c0_i32, %c0_i32_0 : i32, i32
  }
  func.func @transform_3(%arg0: i32) -> (i32, i32) {
    %c0_i32 = arith.constant 0 : i32
    %c0_i32_0 = arith.constant 0 : i32
    %c0_i32_1 = arith.constant 0 : i32
    return %c0_i32, %c0_i32_0 : i32, i32
  }
  func.func @transform_4(%arg0: i32) -> (i32, i32) {
    %c0_i32 = arith.constant 0 : i32
    %c0_i32_0 = arith.constant 0 : i32
    %c0_i32_1 = arith.constant 0 : i32
    return %c0_i32, %c0_i32_0 : i32, i32
  }
  func.func @transform_5(%arg0: i32) -> (i32, i32) {
    %c0_i32 = arith.constant 0 : i32
    %c0_i32_0 = arith.constant 0 : i32
    %c0_i32_1 = arith.constant 0 : i32
    return %c0_i32, %c0_i32_0 : i32, i32
  }
  func.func @transform_6(%arg0: i32) -> (i32, i32) {
    %c0_i32 = arith.constant 0 : i32
    %c0_i32_0 = arith.constant 0 : i32
    %c0_i32_1 = arith.constant 0 : i32
    return %c0_i32, %c0_i32_0 : i32, i32
  }
  func.func @transform_7(%arg0: i32) -> (i32, i32) {
    %c0_i32 = arith.constant 0 : i32
    %c0_i32_0 = arith.constant 0 : i32
    %c0_i32_1 = arith.constant 0 : i32
    return %c0_i32, %c0_i32_0 : i32, i32
  }
  func.func @transform_8(%arg0: i32) -> (i32, i32) {
    %c0_i32 = arith.constant 0 : i32
    %c0_i32_0 = arith.constant 0 : i32
    %c0_i32_1 = arith.constant 0 : i32
    return %c0_i32, %c0_i32_0 : i32, i32
  }
  func.func @transform_9(%arg0: i32) -> (i32, i32) {
    %c0_i32 = arith.constant 0 : i32
    %c0_i32_0 = arith.constant 0 : i32
    return %arg0, %c0_i32 : i32, i32
  }
}

</mosaic_0001>

<bundles_post_ra>
// kernel: tpu_custom_call.1
= control target key start
LH: loop header
LB: loop body
LE: loop exit
PB: predicated region body
PF: predicated region fallthrough
CT: control target
= control target key end

     0   :  { %14 = vsyncpa [#allocation3], 0  ;;  %s1658_s0 = inlined_call_operand.hbm [shape: f32[16,16], index: 0, kind: input, shape index: {}]   ;;  %s1659_s1 = inlined_call_operand.hbm [shape: f32[16,128], index: 1, kind: input, shape index: {}]   ;;  %s1660_s2 = inlined_call_operand.vmem [shape: f32[1,128], index: 2, kind: input, shape index: {}]   ;;  %s1661_s3 = inlined_call_operand.vmem [shape: f32[128,128], index: 3, kind: input, shape index: {}]   ;;  %s1662_s4 = inlined_call_operand.vmem [shape: f32[1,128], index: 4, kind: input, shape index: {}]   ;;  %s1663_s5 = inlined_call_operand.hbm [shape: f32[128,128], index: 5, kind: input, shape index: {}]   ;;  %s1664_s6 = inlined_call_operand.vmem [shape: f32[1,128], index: 6, kind: input, shape index: {}]   ;;  %s1665_s7 = inlined_call_operand.vmem [shape: f32[128,4], index: 7, kind: input, shape index: {}]   ;;  %s1666_s8 = inlined_call_operand.vmem [shape: f32[1,4], index: 8, kind: input, shape index: {}]   ;;  %s1667_s9 = inlined_call_operand.vmem [shape: f32[16,4], index: 9, kind: output, shape index: {}]  }
   0x1   :  { %16 = vsyncpa [#allocation3 + $0x1], 0 }
   0x2   :  { %17 = vsyncpa [#allocation5], 0  ;;  %s1345_s30 = smov 0   ;;  %s1347_s10 = smov 0  }
   0x3   :  { %s1349_s11 = smov 0   ;;  %s1351_s12 = smov 0  }
   0x4 LB: > { %s1364_s13 = sadd.s32 4294967295, %s1285_s12   ;;  %p43_p0 = scmp.ne.s32.totalorder %s1277_s10, %s1273_s30  ;;  %s1285_s12 = sphi %s1351_s12, %s1682_s12   ;;  %s1281_s11 = sphi %s1349_s11, %s1681_s11   ;;  %s1277_s10 = sphi %s1347_s10, %s1680_s10   ;;  %s1273_s30 = sphi %s1345_s30, %s1679_s30  }
   0x5   : > { %p1668_p1 = scmp.eq.s32.totalorder %s1364_s13, 0  ;;  %p835_p2 = scmp.ge.s32.totalorder %s1285_s12, 1 }
   0x6   : > { %p248_p3 = scmp.lt.s32.totalorder %s1285_s12, 3  ;;  %s1287_s16 = smov [#allocation4]  }
   0x7   : > { %p1372_p4 = por %p1668_p1, %p43_p0  ;;  %s260_s17 = sshll.u32 %s1287_s16, 4  ;;  %s261_s17 = int_to_ptr.vmem [resolvable:$true] %s260_s17 }
   0x8   : > { %p1376_p5 = pnand %p835_p2, %p248_p3  ;;  %s1288_s19 = smov [#allocation6]  }
   0x9   : > { %s1671_s14 = scalar_select %p1372_p4, 1, 0 }
   0xa   : > { %s1672_s15 = scalar_select %p1376_p5, 1, 0 }
   0xb   : > { %p1104_p6 = pneg %p1376_p5  ;;  %s282_s20 = sshll.u32 %s1288_s19, 4  ;;  %s1388_s20 = int_to_ptr.vmem [resolvable:$true] %s282_s20 }
   0xc   : > { %s1161_s23 = scalar_lea.hbm %s1659_s1, 256 }
   0xd   : > { %p1384_p7 = pnand %p1104_p6, %p1668_p1  ;;  %p1162_p8 = scmp.ne.s32.totalorder %s1659_s1, %s1161_s23 }
   0xe   : > { %p1168_p12 = scmp.lt.u32.totalorder %s1161_s23, %s1659_s1 }
   0xf   : > { %p1163_p9 = pneg %p1384_p7 }
  0x11   : > { %p1164_p10 = pnand %p1163_p9, %p1162_p8 }
  0x13   : > { %p1165_p11 = pneg %p1164_p10 }
  0x15   : > { %p1170_p13 = pnand %p1168_p12, %p1165_p11 }
  0x17   : > { %1173 = shalt.err (!%p1170_p13)
}
  0x18   : > { %s1174_s28 = scalar_lea.vmem %s261_s17, 256  ;;  %p1182_p6 = scmp.lt.s32.totalorder %s261_s17, %s261_s17 }
  0x19   : > { %p1175_p0 = scmp.ne.s32.totalorder %s261_s17, %s1174_s28  ;;  %p1183_p1 = scmp.lt.s32.totalorder %s1174_s28, %s1174_s28 }
  0x1b   : > { %p1177_p2 = pnand %p1175_p0, %p1163_p9  ;;  %p1184_p4 = por %p1183_p1, %p1182_p6 }
  0x1d   : > { %p1178_p3 = pneg %p1177_p2 }
  0x1f   : > { %p1185_p5 = pnand %p1184_p4, %p1178_p3 }
  0x21   : > { %1188 = shalt.err (!%p1185_p5)
}
  0x22   : > { %s1289_s29 = smov 128   ;;  %s1290_s30 = smov 8  }
  0x23   : > { %1107 = dma.hbm_to_vmem [thread:$0]  (!%p1384_p7), %s1659_s1, 256, %s261_s17, [#allocation5], %s1289_s29, %s1289_s29, %s1290_s30  }
  0x24   : > { %s1189_s23 = scalar_lea.hbm %s1663_s5, 2048 }
  0x25   : > { %p1190_p8 = scmp.ne.s32.totalorder %s1663_s5, %s1189_s23  ;;  %p1196_p5 = scmp.lt.u32.totalorder %s1189_s23, %s1663_s5 }
  0x27   : > { %p1192_p1 = pnand %p1190_p8, %p1163_p9 }
  0x29   : > { %p1193_p4 = pneg %p1192_p1 }
  0x2b   : > { %p1198_p10 = pnand %p1196_p5, %p1193_p4 }
  0x2d   : > { %1201 = shalt.err (!%p1198_p10)
}
  0x2e   : > { %s1202_s17 = scalar_lea.vmem %s1388_s20, 2048  ;;  %p1210_p0 = scmp.lt.s32.totalorder %s1388_s20, %s1388_s20 }
  0x2f   : > { %p1203_p11 = scmp.ne.s32.totalorder %s1388_s20, %s1202_s17  ;;  %p1211_p2 = scmp.lt.s32.totalorder %s1202_s17, %s1202_s17 }
  0x31   : > { %p1205_p12 = pnand %p1203_p11, %p1163_p9  ;;  %p1212_p3 = por %p1211_p2, %p1210_p0 }
  0x33   : > { %p1206_p13 = pneg %p1205_p12 }
  0x35   : > { %p1213_p6 = pnand %p1212_p3, %p1206_p13 }
  0x37   : > { %1216 = shalt.err (!%p1213_p6)
}
  0x38   : > { %1110 = dma.hbm_to_vmem [thread:$0]  (!%p1384_p7), %s1663_s5, 2048, %s1388_s20, [#allocation5], %s1289_s29, %s1289_s29, %s1290_s30  }
  0x39   : > { %s1438_s19 = sadd.s32 1, %s1285_s12   ;;  %s30_s21 = sadd.s32 1, %s1281_s11 }
  0x3a   : > { %s27_s18 = ssub.s32 %s1285_s12, %s1438_s19  ;;  %p37_p9 = scmp.ne.s32.totalorder %s1281_s11, %s1277_s10 }
  0x3b   : > { %p28_p8 = scmp.eq.s32.totalorder %s27_s18, 0  ;;  %p38_p1 = scmp.eq.s32.totalorder %s1285_s12, 0 }
  0x3c   : > { %p1117_p4 = scmp.lt.s32.totalorder %s1285_s12, 2  ;;  %s305_s22 = sand.u32 1, %s1281_s11  }
  0x3d   : > { %s1449_s23 = scalar_select %p28_p8, %s1281_s11, %s30_s21  }
  0x3e   : > { %p39_p5 = por %p38_p1, %p37_p9  ;;  %s839_s24 = sshll.u32 %s305_s22, 3 }
  0x3f   : > { %s840_s25 = sshll.u32 %s1285_s12, 7  ;;  %s309_s20 = scalar_lea.vmem [#allocation2], %s839_s24 }
  0x40   : > { %s1455_s17 = scalar_lea.hbm %s1658_s0, %s840_s25  ;;  %s316_s29 = sshll.u32 %s309_s20, 4  ;;  %s1461_s29 = int_to_ptr.vmem [resolvable:$true] %s316_s29 }
  0x41   : > { %p1457_p7 = pnand %p1117_p4, %p39_p5  ;;  %s306_s12 = scalar_lea.sflag [#allocation3], %s305_s22 }
  0x42   : > { %s1217_s28 = scalar_lea.hbm %s1455_s17, 128  ;;  %s1222_s18 = scalar_lea.hbm %s1658_s0, 256 }
  0x43   : > { %p1218_p10 = scmp.ne.s32.totalorder %s1455_s17, %s1217_s28  ;;  %p1219_p11 = pneg %p1457_p7 }
  0x44   : > { %p1223_p0 = scmp.lt.u32.totalorder %s1455_s17, %s1658_s0  ;;  %p1224_p2 = scmp.lt.u32.totalorder %s1222_s18, %s1217_s28 }
  0x45   : > { %p1220_p12 = pnand %p1219_p11, %p1218_p10  ;;  %p1226_p6 = scmp.lt.u32.totalorder %s1217_s28, %s1455_s17 }
  0x46   : > { %p1225_p3 = por %p1224_p2, %p1223_p0 }
  0x47   : > { %p1221_p13 = pneg %p1220_p12 }
  0x48   : > { %p1227_p9 = por %p1226_p6, %p1225_p3 }
  0x4a   : > { %p1228_p8 = pnand %p1227_p9, %p1221_p13 }
  0x4c   : > { %1231 = shalt.err (!%p1228_p8)
}
  0x4d   : > { %s1232_s22 = scalar_lea.vmem %s1461_s29, 128  ;;  %s1291_s26 = smov [#allocation2]  }
  0x4e   : > { %p1233_p1 = scmp.ne.s32.totalorder %s1461_s29, %s1232_s22  ;;  %s1237_s27 = sshll.u32 %s1291_s26, 4  ;;  %s1238_s27 = int_to_ptr.vmem [resolvable:$false] %s1237_s27 }
  0x4f   : > { %s1239_s20 = scalar_lea.vmem %s1238_s27, 256  ;;  %p1240_p10 = scmp.lt.s32.totalorder %s1461_s29, %s1238_s27 }
  0x50   : > { %p1235_p4 = pnand %p1233_p1, %p1219_p11  ;;  %p1241_p12 = scmp.lt.s32.totalorder %s1239_s20, %s1232_s22 }
  0x52   : > { %p1236_p5 = pneg %p1235_p4  ;;  %p1242_p0 = por %p1241_p12, %p1240_p10 }
  0x54   : > { %p1243_p2 = pnand %p1242_p0, %p1236_p5 }
  0x56   : > { %1246 = shalt.err (!%p1243_p2)
}
  0x57   : > { %1114 = dma.hbm_to_vmem [thread:$0]  (!%p1457_p7), %s1455_s17, 128, %s1461_s29, %s306_s12  }
  0x58   : > { %p1675_p13 = scmp.ne.s32.totalorder %s1672_s15, 0 }
  0x59   : > { %s327_s28 = sand.u32 (!%p1675_p13), 1, %s1277_s10   ;;  %p1676_p11 = scmp.ne.s32.totalorder (!%p1675_p13), %s1671_s14, 0 }
  0x5a   : > { %325 = sbr.rel (%p1675_p13) target bundleno = 989 (0x3dd), region = 56  ;;  %s842_s16 = sshll.u32 (!%p1675_p13), %s327_s28, 3 }
  0x5b   : > { %s328_s21 = scalar_lea.sflag (!%p1675_p13), [#allocation3], %s327_s28  ;;  %s331_s18 = scalar_lea.vmem (!%p1675_p13), [#allocation2], %s842_s16 }
  0x61   : > { %1264 = dma.done.wait (%p1676_p11), %s328_s21, 128  }
  0x62   : > { %1266 = vsyncadd (%p1676_p11), %s328_s21, 4294967168  ;;  %p1677_p3 = scmp.eq.s32.totalorder %s1364_s13, 0 }
  0x64   : > { %1268 = dma.done.wait (%p1677_p3), [#allocation5], 2304   ;;  %p1678_p6 = pmov %p1677_p3 }
  0x65   : > { %v1292_v0 = vmov 0.0|0.0   ;;  %vm1293_vm0 = vmmov 0   ;;  %v1294_v1 = vmov 0.0   ;;  %v378_v2 = vld [vmem:[#allocation4] sm:$0xff]  ;;  %v379_v3 = vld [vmem:[#allocation4 + $0x8] sm:$0xff]  ;;  %v462_v5 = vld [vmem:[%s1661_s3] sm:$0xff] }
  0x66   : > { %1270 = vsyncadd (%p1678_p6), [#allocation5], 4294964992  ;;  %1019 = vmatprep.subr.bf16.mxu0 %v1292_v0  ;;  %911 = vmatprep.mubr.msk.f32.mxu0 %vm1293_vm0, %v1294_v1  ;;  %v1020_v4 = vpack.c.bf16 %v379_v3, %v378_v2  ;;  %v463_v6 = vld [vmem:[%s1661_s3 + $0x8] sm:$0xff]  ;;  %v464_v7 = vld [vmem:[%s1661_s3 + $0x10] sm:$0xff]  ;;  %vm387_vm1 = vcmask 130048   ;;  %p373_p7 = scmp.lt.s32.totalorder %s1364_s13, 1 }
  0x67   : > { %1022 = vmatprep.subr.bf16.mxu1 %v1292_v0  ;;  %946 = vmatprep.mubr.msk.f32.mxu1 %vm1293_vm0, %v1294_v1  ;;  %v1023_v8 = vpack.c.bf16 %v463_v6, %v462_v5  ;;  %v465_v9 = vld [vmem:[%s1661_s3 + $0x18] sm:$0xff]  ;;  %v377_v10 = vld [vmem:[%s331_s18] sm:$0xff]  ;;  %v468_v15 = vld [vmem:[%s1661_s3 + $0x30] sm:$0xff]  ;;  %vm748_vm2 = vcmask 31744  }
  0x68   : > { %1021 = vmatpush3.bf16.msra.mxu0 %v1020_v4  ;;  %v1026_v11 = vpack.c.bf16 %v465_v9, %v464_v7  ;;  %v466_v12 = vld [vmem:[%s1661_s3 + $0x20] sm:$0xff]  ;;  %v467_v13 = vld [vmem:[%s1661_s3 + $0x28] sm:$0xff]  ;;  %v469_v16 = vld [vmem:[%s1661_s3 + $0x38] sm:$0xff]  ;;  %s1684_s13 = smov (!%p373_p7, %s1364_s13), 1 }
  0x69   : > { %1024 = vmatpush3.bf16.msra.mxu1 %v1023_v8  ;;  %1046 = vmatprep.subr.bf16.mxu0 %v1292_v0  ;;  %v1029_v14 = vpack.c.bf16 %v467_v13, %v466_v12  ;;  %v1032_v17 = vpack.c.bf16 %v469_v16, %v468_v15  ;;  %v470_v18 = vld [vmem:[%s1661_s3 + $0x40] sm:$0xff]  ;;  %v471_v19 = vld [vmem:[%s1661_s3 + $0x48] sm:$0xff]  ;;  %v472_v21 = vld [vmem:[%s1661_s3 + $0x50] sm:$0xff]  ;;  %s845_s22 = sshll.u32 %s1684_s13, 3 }
  0x6a   : > { %1025 = vmatprep.subr.bf16.mxu1 %v1292_v0  ;;  %v1035_v20 = vpack.c.bf16 %v471_v19, %v470_v18  ;;  %v473_v22 = vld [vmem:[%s1661_s3 + $0x58] sm:$0xff]  ;;  %v474_v24 = vld [vmem:[%s1661_s3 + $0x60] sm:$0xff]  ;;  %v475_v25 = vld [vmem:[%s1661_s3 + $0x68] sm:$0xff]  ;;  %s376_s20 = scalar_lea.vmem %s1667_s9, %s845_s22 }
  0x6b   : > { %912 = vmatmul.mubr.msk.f32.vlgmr.msra.gmra.mrb[0].mxu0 %vm387_vm1, %v377_v10  ;;  %v1038_v23 = vpack.c.bf16 %v473_v22, %v472_v21  ;;  %v1041_v26 = vpack.c.bf16 %v475_v25, %v474_v24  ;;  %v476_v27 = vld [vmem:[%s1661_s3 + $0x70] sm:$0xff]  ;;  %v477_v28 = vld [vmem:[%s1661_s3 + $0x78] sm:$0xff]  ;;  %v556_v30 = vld [vmem:[#allocation6] sm:$0xff] }
  0x6c   : > { %981 = vmatprep.mubr.msk.f32.mxu0 %vm1293_vm0, %v1294_v1  ;;  %v1044_v29 = vpack.c.bf16 %v477_v28, %v476_v27  ;;  %v557_v31 = vld [vmem:[#allocation6 + $0x8] sm:$0xff]  ;;  %v558_v32 = vld [vmem:[#allocation6 + $0x10] sm:$0xff]  ;;  %v559_v34 = vld [vmem:[#allocation6 + $0x18] sm:$0xff] }
  0x6d   : > { %1027 = vmatpush3.bf16.msra.mxu1 %v1026_v11  ;;  %v1047_v33 = vpack.c.bf16 %v557_v31, %v556_v30  ;;  %v1050_v35 = vpack.c.bf16 %v559_v34, %v558_v32  ;;  %v560_v36 = vld [vmem:[#allocation6 + $0x20] sm:$0xff]  ;;  %v561_v37 = vld [vmem:[#allocation6 + $0x28] sm:$0xff]  ;;  %v562_v39 = vld [vmem:[#allocation6 + $0x30] sm:$0xff] }
  0x6e   : > { %1028 = vmatprep.subr.bf16.mxu1 %v1292_v0  ;;  %v1053_v38 = vpack.c.bf16 %v561_v37, %v560_v36  ;;  %v563_v40 = vld [vmem:[#allocation6 + $0x38] sm:$0xff]  ;;  %v564_v42 = vld [vmem:[#allocation6 + $0x40] sm:$0xff]  ;;  %v565_v43 = vld [vmem:[#allocation6 + $0x48] sm:$0xff] }
  0x6f   : > { %1048 = vmatpush3.bf16.msra.mxu0 %v1047_v33  ;;  %v1056_v41 = vpack.c.bf16 %v563_v40, %v562_v39  ;;  %v1059_v44 = vpack.c.bf16 %v565_v43, %v564_v42  ;;  %v566_v45 = vld [vmem:[#allocation6 + $0x50] sm:$0xff]  ;;  %v567_v46 = vld [vmem:[#allocation6 + $0x58] sm:$0xff]  ;;  %v568_v48 = vld [vmem:[#allocation6 + $0x60] sm:$0xff] }
  0x70   : > { %1049 = vmatprep.subr.bf16.mxu0 %v1292_v0  ;;  %v1062_v47 = vpack.c.bf16 %v567_v46, %v566_v45  ;;  %v569_v49 = vld [vmem:[#allocation6 + $0x68] sm:$0xff]  ;;  %v846_v51 = vld [vmem:[%s1660_s2] ss:$0 sm:$0xff]  ;;  %v570_v56 = vld [vmem:[#allocation6 + $0x70] sm:$0xff] }
  0x71   : > { %1030 = vmatpush3.bf16.msra.mxu1 %v1029_v14  ;;  %v1065_v50 = vpack.c.bf16 %v569_v49, %v568_v48  ;;  %v571_v57 = vld [vmem:[#allocation6 + $0x78] sm:$0xff]  ;;  %v654_v59 = vld [vmem:[%s1665_s7] sm:$0xff]  ;;  %v655_v60 = vld [vmem:[%s1665_s7 + $0x8] sm:$0xff] }
  0x72   : > { %1031 = vmatprep.subr.bf16.mxu1 %v1292_v0  ;;  %v1068_v58 = vpack.c.bf16 %v571_v57, %v570_v56  ;;  %v656_v61 = vld [vmem:[%s1665_s7 + $0x10] sm:$0xff]  ;;  %v1071_v62 = vpack.c.bf16 %v655_v60, %v654_v59  ;;  %v657_v63 = vld [vmem:[%s1665_s7 + $0x18] sm:$0xff]  ;;  %v658_v2 = vld [vmem:[%s1665_s7 + $0x20] sm:$0xff] }
  0x73   : > { %1051 = vmatpush3.bf16.msra.mxu0 %v1050_v35  ;;  %v659_v3 = vld [vmem:[%s1665_s7 + $0x28] sm:$0xff]  ;;  %v660_v5 = vld [vmem:[%s1665_s7 + $0x30] sm:$0xff]  ;;  %v661_v6 = vld [vmem:[%s1665_s7 + $0x38] sm:$0xff] }
  0x74   : > { %1052 = vmatprep.subr.bf16.mxu0 %v1292_v0  ;;  %v1077_v4 = vpack.c.bf16 %v659_v3, %v658_v2  ;;  %v1080_v7 = vpack.c.bf16 %v661_v6, %v660_v5  ;;  %v662_v8 = vld [vmem:[%s1665_s7 + $0x40] sm:$0xff]  ;;  %v663_v9 = vld [vmem:[%s1665_s7 + $0x48] sm:$0xff]  ;;  %v664_v16 = vld [vmem:[%s1665_s7 + $0x50] sm:$0xff] }
  0x75   : > { %1033 = vmatpush3.bf16.msra.mxu1 %v1032_v17  ;;  %v1083_v10 = vpack.c.bf16 %v663_v9, %v662_v8  ;;  %v848_v11 = vld [vmem:[%s1662_s4] ss:$0 sm:$0xff]  ;;  %v665_v17 = vld [vmem:[%s1665_s7 + $0x58] sm:$0xff]  ;;  %v668_v22 = vld [vmem:[%s1665_s7 + $0x70] sm:$0xff] }
  0x76   : > { %1034 = vmatprep.subr.bf16.mxu1 %v1292_v0  ;;  %v1086_v18 = vpack.c.bf16 %v665_v17, %v664_v16  ;;  %v666_v19 = vld [vmem:[%s1665_s7 + $0x60] sm:$0xff] }
  0x77   : > { %1054 = vmatpush3.bf16.msra.mxu0 %v1053_v38  ;;  %v849_v25 = vld [vmem:[%s1664_s6] ss:$0 sm:$0xff] }
  0x78   : > { %1055 = vmatprep.subr.bf16.mxu0 %v1292_v0  ;;  %v850_v33 = vld [vmem:[%s1666_s8] ss:$0 sm:$0xff] }
  0x79   : > { %1036 = vmatpush3.bf16.msra.mxu1 %v1035_v20  ;;  %v667_v20 = vld [vmem:[%s1665_s7 + $0x68] sm:$0xff] }
  0x7a   : > { %1037 = vmatprep.subr.bf16.mxu1 %v1292_v0  ;;  %v1089_v21 = vpack.c.bf16 %v667_v20, %v666_v19 }
  0x7b   : > { %1057 = vmatpush3.bf16.msra.mxu0 %v1056_v41 }
  0x7c   : > { %1058 = vmatprep.subr.bf16.mxu0 %v1292_v0 }
  0x7d   : > { %1039 = vmatpush3.bf16.msra.mxu1 %v1038_v23  ;;  %v669_v23 = vld [vmem:[%s1665_s7 + $0x78] sm:$0xff] }
  0x7e   : > { %1040 = vmatprep.subr.bf16.mxu1 %v1292_v0  ;;  %v1092_v24 = vpack.c.bf16 %v669_v23, %v668_v22 }
  0x7f   : > { %1060 = vmatpush3.bf16.msra.mxu0 %v1059_v44 }
  0x80   : > { %1061 = vmatprep.subr.bf16.mxu0 %v1292_v0 }
  0x81   : > { %1042 = vmatpush3.bf16.msra.mxu1 %v1041_v26 }
  0x82   : > { %1043 = vmatprep.subr.bf16.mxu1 %v1292_v0 }
  0x83   : > { %1063 = vmatpush3.bf16.msra.mxu0 %v1062_v47 }
  0x84   : > { %1064 = vmatprep.subr.bf16.mxu0 %v1292_v0 }
  0x85   : > { %1045 = vmatpush3.bf16.msra.mxu1 %v1044_v29 }
  0x86   : > { %1070 = vmatprep.subr.bf16.mxu1 %v1292_v0 }
  0x87   : > { %1066 = vmatpush3.bf16.msra.mxu0 %v1065_v50 }
  0x88   : > { %1067 = vmatprep.subr.bf16.mxu0 %v1292_v0 }
  0x8b   : > { %1069 = vmatpush3.bf16.msra.mxu0 %v1068_v58 }
 0x13e   : > { %v457_v52 = vpop.f32.mrb[0].mxu0 }
 0x13f   : > { %v458_v53 = vadd.f32 %v846_v51, %v457_v52  ;;  %v913_v54 = vpop.f32.mrb[1].mxu0 }
 0x141   : > { %v461_v55 = vmax.f32 %v458_v53, 0.0 }
 0x143   : > { %947 = vmatmul.mubr.f32.vlgmr.msra.gmra.mrb[0].mxu1 %v461_v55 }
 0x144   : > { %1016 = vmatprep.mubr.msk.f32.mxu1 %vm1293_vm0, %v1294_v1  ;;  %1072 = vmatpush3.bf16.msra.mxu1 %v1071_v62  ;;  %v1074_v1 = vpack.c.bf16 %v657_v63, %v656_v61 }
 0x145   : > { %1073 = vmatprep.subr.bf16.mxu1 %v1292_v0 }
 0x148   : > { %1075 = vmatpush3.bf16.msra.mxu1 %v1074_v1 }
 0x149   : > { %1076 = vmatprep.subr.bf16.mxu1 %v1292_v0 }
 0x14c   : > { %1078 = vmatpush3.bf16.msra.mxu1 %v1077_v4 }
 0x14d   : > { %1079 = vmatprep.subr.bf16.mxu1 %v1292_v0 }
 0x150   : > { %1081 = vmatpush3.bf16.msra.mxu1 %v1080_v7 }
 0x151   : > { %1082 = vmatprep.subr.bf16.mxu1 %v1292_v0 }
 0x154   : > { %1084 = vmatpush3.bf16.msra.mxu1 %v1083_v10 }
 0x155   : > { %1085 = vmatprep.subr.bf16.mxu1 %v1292_v0 }
 0x158   : > { %1087 = vmatpush3.bf16.msra.mxu1 %v1086_v18 }
 0x159   : > { %1088 = vmatprep.subr.bf16.mxu1 %v1292_v0 }
 0x15c   : > { %1090 = vmatpush3.bf16.msra.mxu1 %v1089_v21 }
 0x15d   : > { %1091 = vmatprep.subr.bf16.mxu1 %v1292_v0 }
 0x160   : > { %1093 = vmatpush3.bf16.msra.mxu1 %v1092_v24 }
 0x216   : > { %v551_v12 = vpop.f32.mrb[0].mxu1 }
 0x217   : > { %v552_v13 = vadd.f32 %v848_v11, %v551_v12  ;;  %v948_v14 = vpop.f32.mrb[1].mxu1 }
 0x219   : > { %v555_v15 = vmax.f32 %v552_v13, 0.0 }
 0x21b   : > { %982 = vmatmul.mubr.f32.vlgmr.msra.gmra.mrb[2].mxu0 %v555_v15 }
 0x2ee   : > { %v645_v26 = vpop.f32.mrb[2].mxu0 }
 0x2ef   : > { %v646_v27 = vadd.f32 %v849_v25, %v645_v26  ;;  %v983_v28 = vpop.f32.mrb[3].mxu0 }
 0x2f1   : > { %v649_v0 = vadd.f32 3.0, %v646_v27 }
 0x2f3   : > { %v650_v29 = vmax.f32 %v649_v0, 0.0 }
 0x2f5   : > { %v651_v30 = vmin.f32 %v650_v29, 6.0 }
 0x2f7   : > { %v652_v31 = vmul.f32 %v651_v30, %v646_v27 }
 0x2f9   : > { %v653_v32 = vmul.f32 0.16666667, %v652_v31 }
 0x2fb   : > { %1017 = vmatmul.mubr.f32.vlgmr.msra.gmra.mrb[2].mxu1 %v653_v32 }
 0x3ce   : > { %v743_v34 = vpop.f32.mrb[2].mxu1 }
 0x3cf   : > { %v744_v35 = vadd.f32 %v850_v33, %v743_v34  ;;  %v1018_v36 = vpop.f32.mrb[3].mxu1 }
 0x3d1   : > { %1159 = vtanh.f32 %v744_v35 }
 0x3db   : > { %v1160_v37 = vpop.eup %1159 }
 0x3dc   : > { %749 = vst.msk [vmem:[%s376_s20] sm:$0xff] %vm748_vm2, %v1160_v37 }
 0x3dd PF: > { %p20_p9 = scmp.ge.s32.totalorder %s1438_s19, 4   ;;  %s1679_s30 = smov %s1277_s10 }
 0x3de   : > { %s1680_s10 = smov %s1281_s11  ;;  %s1681_s11 = smov %s1449_s23 }
 0x3df   : > { %s1682_s12 = smov %s1438_s19  ;;  %22 = sbr.rel (!%p20_p9) target bundleno = 4 (0x4), region = 104 }
 0x3e6   :  { %769 = vsyncpa [#allocation3], 1 }
 0x3e7   :  { %771 = vsyncpa [#allocation3 + $0x1], 1 }
 0x3e8   :  { %772 = vsyncpa [#allocation5], 1 }

</bundles_post_ra>
